<compile_context>
chip_gen: v5e
topology: v5e:2x2
jax: 0.10.0
libtpu: 0.0.40
codegen_flags: <defaults>
</compile_context>

<pallas_src>
import functools

import jax
import jax.numpy as jnp
from jax.experimental import pallas as pl
from jax.experimental.pallas import tpu as pltpu


# ------------------------------------------------------------------
# Fused Pallas kernel: matmul (MXU) + bias + InstanceNorm + activation
# ------------------------------------------------------------------
def _conv_norm_act_kernel(p_ref, w_ref, bias_ref, g_ref, b_ref, o_ref,
                          *, apply_norm, act, eps=1e-5):
    # p_ref: (Cin*K*K, OH*OW)  -- im2col patches of one sample
    # w_ref: (Cout, Cin*K*K)   -- conv weight, channel-major flattening
    # bias/g/b: (Cout, 1)
    # o_ref: (Cout, OH*OW)
    x = jnp.dot(w_ref[...], p_ref[...], preferred_element_type=jnp.float32)
    x = x + bias_ref[...]
    if apply_norm:
        # InstanceNorm2d: per-(sample, channel) mean/biased-var over spatial, eps=1e-5,
        # affine gamma/beta (initialized to 1/0 like nn.InstanceNorm2d(affine=True)).
        mean = jnp.mean(x, axis=-1, keepdims=True)
        var = jnp.mean(jnp.square(x - mean), axis=-1, keepdims=True)
        x = (x - mean) * jax.lax.rsqrt(var + eps)
        x = x * g_ref[...] + b_ref[...]
    if act == "lrelu":
        x = jnp.where(x >= 0, x, 0.2 * x)
    elif act == "relu":
        x = jnp.maximum(x, 0.0)
    elif act == "tanh":
        x = jnp.tanh(x)
    # act == "none": identity
    o_ref[...] = x.astype(o_ref.dtype)


def fused_conv_layer(p, w2, bias, gamma, beta, apply_norm, act):
    """p: (N, Cin*K*K, OH*OW), w2: (Cout, Cin*K*K) -> (N, Cout, OH*OW) float32."""
    N, CKK, OHW = p.shape
    Cout = w2.shape[0]
    kernel = functools.partial(_conv_norm_act_kernel, apply_norm=apply_norm, act=act)
    flops = 2 * N * Cout * CKK * OHW
    transcendentals = N * Cout * OHW if act == "tanh" else 0
    bytes_accessed = 4 * (p.size + N * (w2.size + 3 * Cout) + N * Cout * OHW)
    out = pl.pallas_call(
        kernel,
        out_shape=jax.ShapeDtypeStruct((N, Cout, OHW), jnp.float32),
        grid=(N,),
        in_specs=[
            pl.BlockSpec((None, CKK, OHW), lambda n: (n, 0, 0)),   # patches (per sample)
            pl.BlockSpec((Cout, CKK), lambda n: (0, 0)),           # weights
            pl.BlockSpec((Cout, 1), lambda n: (0, 0)),             # bias
            pl.BlockSpec((Cout, 1), lambda n: (0, 0)),             # gamma
            pl.BlockSpec((Cout, 1), lambda n: (0, 0)),             # beta
        ],
        out_specs=pl.BlockSpec((None, Cout, OHW), lambda n: (n, 0, 0)),
        compiler_params=pltpu.CompilerParams(dimension_semantics=("parallel",)),
        cost_estimate=pl.CostEstimate(flops=flops,
                                      transcendentals=transcendentals,
                                      bytes_accessed=bytes_accessed),
    )(p, w2, bias.reshape(Cout, 1), gamma.reshape(Cout, 1), beta.reshape(Cout, 1))
    return out


# ------------------------------------------------------------------
# Host-side im2col glue (patch matrix in the kernel's preferred layout)
# ------------------------------------------------------------------
def _im2col(xp, K, stride, OH, OW):
    """xp: padded input (N, Cin, Hp, Wp) -> patches (N, Cin*K*K, OH*OW).
    Flattened patch order is (Cin major, kh, kw) -- matches PyTorch weight.reshape(Cout, -1)."""
    N, Cin = xp.shape[0], xp.shape[1]
    cols = []
    for kh in range(K):
        for kw in range(K):
            cols.append(xp[:, :, kh:kh + stride * OH:stride, kw:kw + stride * OW:stride])
    p = jnp.stack(cols, axis=2)                      # (N, Cin, K*K, OH, OW)
    return p.reshape(N, Cin * K * K, OH * OW)


def conv2d_fused(x, w, bias, gamma, beta, stride, pad, apply_norm, act):
    """x: (N, Cin, H, W), w: (Cout, Cin, K, K) [PyTorch Conv2d layout], bias: (Cout,)."""
    N, Cin, H, W = x.shape
    Cout, _, K, _ = w.shape
    OH = (H + 2 * pad - K) // stride + 1
    OW = (W + 2 * pad - K) // stride + 1
    xp = jnp.pad(x, ((0, 0), (0, 0), (pad, pad), (pad, pad)))
    p = _im2col(xp, K, stride, OH, OW)               # (N, Cin*K*K, OH*OW)
    w2 = w.reshape(Cout, Cin * K * K)                # channel-major flattening, no transpose
    out = fused_conv_layer(p, w2, bias, gamma, beta, apply_norm, act)
    return out.reshape(N, Cout, OH, OW)


def conv_transpose2d_fused(x, w, gamma, beta, stride, pad, apply_norm, act):
    """x: (N, Cin, H, W), w: (Cin, Cout, K, K) [PyTorch ConvTranspose2d layout], bias=False."""
    N, Cin, H, W = x.shape
    _, Cout, K, _ = w.shape
    OH = (H - 1) * stride - 2 * pad + K
    OW = (W - 1) * stride - 2 * pad + K
    # Equivalent forward conv: interior-dilate by (stride-1), edge-pad by K-1-pad,
    # stride-1 conv with flipped kernel and swapped in/out channels.
    lo = K - 1 - pad
    zero = jnp.asarray(0.0, x.dtype)
    xp = jax.lax.pad(x, zero, ((0, 0, 0), (0, 0, 0),
                               (lo, lo, stride - 1), (lo, lo, stride - 1)))
    p = _im2col(xp, K, 1, OH, OW)                    # (N, Cin*K*K, OH*OW)
    w_conv = jnp.flip(w, axis=(2, 3)).transpose(1, 0, 2, 3).reshape(Cout, Cin * K * K)
    bias = jnp.zeros((Cout,), jnp.float32)
    out = fused_conv_layer(p, w_conv, bias, gamma, beta, apply_norm, act)
    return out.reshape(N, Cout, OH, OW)


# ------------------------------------------------------------------
# AutoEncoder structure (mirrors build_layers / encode / decode / forward)
# ------------------------------------------------------------------
def build_configs(cfg):
    n_layers, n_skip, n_attr = cfg["n_layers"], cfg["n_skip"], cfg["n_attr"]
    enc_cfgs, dec_cfgs = [], []
    n_in, n_out = cfg["img_fm"], cfg["init_fm"]
    for i in range(n_layers):
        skip = n_layers - (n_skip + 1) <= i < n_layers - 1
        n_dec_in = n_out + n_attr + (n_out if skip else 0)
        n_dec_out = n_in
        enc_cfgs.append(dict(n_in=n_in, n_out=n_out, norm=(i > 0), act="lrelu"))
        dec_cfgs.append(dict(n_in=n_dec_in, n_out=n_dec_out,
                             norm=(i > 0), act="relu" if i > 0 else "tanh"))
        n_in = n_out
        n_out = min(2 * n_out, cfg["max_fm"])
    # dec_layers are built with insert(0, ...) in the reference -> reverse build order
    return enc_cfgs, dec_cfgs[::-1]


def init_params(key, enc_cfgs, dec_cfgs, K=4):
    params = {"enc": [], "dec": []}
    for c in enc_cfgs:
        key, kw, kb = jax.random.split(key, 3)
        bound = 1.0 / float(c["n_in"] * K * K) ** 0.5
        w = jax.random.uniform(kw, (c["n_out"], c["n_in"], K, K), jnp.float32, -bound, bound)
        b = jax.random.uniform(kb, (c["n_out"],), jnp.float32, -bound, bound)
        params["enc"].append(dict(
            w=w, b=b,
            gamma=jnp.ones((c["n_out"],), jnp.float32),
            beta=jnp.zeros((c["n_out"],), jnp.float32)))
    for c in dec_cfgs:
        key, kw = jax.random.split(key)
        bound = 1.0 / float(c["n_in"] * K * K) ** 0.5
        # PyTorch ConvTranspose2d weight layout: (in_channels, out_channels, K, K), bias=False
        w = jax.random.uniform(kw, (c["n_in"], c["n_out"], K, K), jnp.float32, -bound, bound)
        params["dec"].append(dict(
            w=w,
            gamma=jnp.ones((c["n_out"],), jnp.float32),
            beta=jnp.zeros((c["n_out"],), jnp.float32)))
    return params, key


def autoencoder_forward(params, cfg, x, y):
    enc_cfgs, dec_cfgs = cfg["enc_cfgs"], cfg["dec_cfgs"]
    n_attr, n_skip = cfg["n_attr"], cfg["n_skip"]
    bs = x.shape[0]
    assert x.shape[1:] == (cfg["img_fm"], cfg["img_sz"], cfg["img_sz"])
    assert y.shape == (bs, n_attr)

    # ---- encode ----
    enc_outputs = [x]
    for lcfg, p in zip(enc_cfgs, params["enc"]):
        h = conv2d_fused(enc_outputs[-1], p["w"], p["b"], p["gamma"], p["beta"],
                         stride=2, pad=1, apply_norm=lcfg["norm"], act=lcfg["act"])
        # enc_dropout == 0 -> no dropout
        enc_outputs.append(h)

    # ---- decode ----
    dec_outputs = [enc_outputs[-1]]
    for i, (lcfg, p) in enumerate(zip(dec_cfgs, params["dec"])):
        size = dec_outputs[-1].shape[2]
        y_exp = jnp.broadcast_to(y.reshape(bs, n_attr, 1, 1), (bs, n_attr, size, size))
        inputs = [dec_outputs[-1], y_exp]
        if 0 < i <= n_skip:
            inputs.append(enc_outputs[-1 - i])
        inp = jnp.concatenate(inputs, axis=1)
        h = conv_transpose2d_fused(inp, p["w"], p["gamma"], p["beta"],
                                   stride=2, pad=1, apply_norm=lcfg["norm"], act=lcfg["act"])
        # dec_dropout == 0 -> no dropout
        dec_outputs.append(h)

    assert dec_outputs[-1].shape == (bs, cfg["img_fm"], cfg["img_sz"], cfg["img_sz"])
    return enc_outputs, dec_outputs


# ------------------------------------------------------------------
if __name__ == "__main__":
    cfg = dict(
        img_sz=16, img_fm=3, instance_norm=True, init_fm=8, max_fm=32,
        n_layers=3, n_skip=1, deconv_method="convtranspose",
        dec_dropout=0.0, n_attr=4,
    )
    enc_cfgs, dec_cfgs = build_configs(cfg)
    cfg["enc_cfgs"], cfg["dec_cfgs"] = enc_cfgs, dec_cfgs

    key = jax.random.PRNGKey(0)
    params, key = init_params(key, enc_cfgs, dec_cfgs)
    kx, ky = jax.random.split(key)
    x = jax.random.normal(kx, (2, cfg["img_fm"], cfg["img_sz"], cfg["img_sz"]), jnp.float32)
    y = jax.random.normal(ky, (2, cfg["n_attr"]), jnp.float32)

    enc_outs, dec_outs = autoencoder_forward(params, cfg, x, y)
    jax.block_until_ready(dec_outs[-1])

    # shape / sanity checks (mirror the reference asserts)
    assert len(enc_outs) == cfg["n_layers"] + 1
    assert len(dec_outs) == cfg["n_layers"] + 1
    assert enc_outs[-1].shape == (2, 32, 2, 2)
    assert dec_outs[-1].shape == (2, cfg["img_fm"], cfg["img_sz"], cfg["img_sz"])
    assert bool(jnp.all(jnp.isfinite(dec_outs[-1])))
    # last decoder layer is Tanh -> bounded output
    assert bool(jnp.all(jnp.abs(dec_outs[-1]) <= 1.0))

    print("KERNEL_OK")
</pallas_src>

<mosaic_0001>
module attributes {stable_mosaic.version = 11 : i64} {
  func.func @_conv_norm_act_kernel(%arg0: i32, %arg1: memref<1x48x64xf32, #tpu.memory_space<vmem>>, %arg2: memref<8x48xf32, #tpu.memory_space<vmem>>, %arg3: memref<8x1xf32, #tpu.memory_space<vmem>>, %arg4: memref<8x1xf32, #tpu.memory_space<vmem>>, %arg5: memref<8x1xf32, #tpu.memory_space<vmem>>, %arg6: memref<1x8x64xf32, #tpu.memory_space<vmem>>) attributes {dimension_semantics = [#tpu.dimension_semantics<parallel>], iteration_bounds = array<i64: 2>, scalar_prefetch = 0 : i64, scratch_operands = 0 : i64, tpu.core_type = #tpu.core_type<tc>, window_params = [{transform_indices = @transform_0, window_bounds = array<i64: 1, 48, 64>}, {pipeline_mode = #tpu.pipeline_mode<synchronous>, transform_indices = @transform_1, window_bounds = array<i64: 8, 48>}, {pipeline_mode = #tpu.pipeline_mode<synchronous>, transform_indices = @transform_2, window_bounds = array<i64: 8, 1>}, {pipeline_mode = #tpu.pipeline_mode<synchronous>, transform_indices = @transform_3, window_bounds = array<i64: 8, 1>}, {pipeline_mode = #tpu.pipeline_mode<synchronous>, transform_indices = @transform_4, window_bounds = array<i64: 8, 1>}, {transform_indices = @transform_5, window_bounds = array<i64: 1, 8, 64>}]} {
    %c0 = arith.constant 0 : index
    %c0_0 = arith.constant 0 : index
    %0 = vector.load %arg2[%c0, %c0_0] : memref<8x48xf32, #tpu.memory_space<vmem>>, vector<8x48xf32>
    %c0_1 = arith.constant 0 : index
    %c0_2 = arith.constant 0 : index
    %c0_3 = arith.constant 0 : index
    %1 = vector.load %arg1[%c0_1, %c0_2, %c0_3] : memref<1x48x64xf32, #tpu.memory_space<vmem>>, vector<1x48x64xf32>
    %2 = vector.shape_cast %1 : vector<1x48x64xf32> to vector<48x64xf32>
    %cst = arith.constant dense<0.000000e+00> : vector<8x64xf32>
    %3 = tpu.matmul %0, %2, %cst {dimension_numbers = #tpu.dot_dimension_numbers<[1], [0], [0], [1], [0, 0, 1, 1], [], []>} : vector<8x48xf32>, vector<48x64xf32>, vector<8x64xf32> -> vector<8x64xf32>
    %c0_4 = arith.constant 0 : index
    %c0_5 = arith.constant 0 : index
    %4 = vector.load %arg3[%c0_4, %c0_5] : memref<8x1xf32, #tpu.memory_space<vmem>>, vector<8x1xf32>
    %5 = vector.broadcast %4 : vector<8x1xf32> to vector<8x64xf32>
    %6 = arith.addf %3, %5 : vector<8x64xf32>
    %cst_6 = arith.constant 0.000000e+00 : f32
    %7 = vector.broadcast %cst_6 : f32 to vector<8x64xf32>
    %8 = arith.cmpf oge, %6, %7 : vector<8x64xf32>
    %cst_7 = arith.constant 2.000000e-01 : f32
    %9 = vector.broadcast %cst_7 : f32 to vector<8x64xf32>
    %10 = arith.mulf %9, %6 : vector<8x64xf32>
    %11 = arith.select %8, %6, %10 : vector<8x64xi1>, vector<8x64xf32>
    %c0_8 = arith.constant 0 : index
    %c0_9 = arith.constant 0 : index
    %c0_10 = arith.constant 0 : index
    %12 = vector.load %arg6[%c0_8, %c0_9, %c0_10] : memref<1x8x64xf32, #tpu.memory_space<vmem>>, vector<1x8x64xf32>
    %13 = vector.shape_cast %12 : vector<1x8x64xf32> to vector<8x64xf32>
    %14 = vector.shape_cast %11 : vector<8x64xf32> to vector<1x8x64xf32>
    tpu.vector_store %arg6[%c0_8, %c0_9, %c0_10], %14 {strides = array<i32>} : memref<1x8x64xf32, #tpu.memory_space<vmem>>, vector<1x8x64xf32>,
    return
  }
  func.func @transform_0(%arg0: i32) -> (i32, i32, i32) {
    %c0_i32 = arith.constant 0 : i32
    %c0_i32_0 = arith.constant 0 : i32
    %c0_i32_1 = arith.constant 0 : i32
    return %arg0, %c0_i32, %c0_i32_0 : i32, i32, i32
  }
  func.func @transform_1(%arg0: i32) -> (i32, i32) {
    %c0_i32 = arith.constant 0 : i32
    %c0_i32_0 = arith.constant 0 : i32
    %c0_i32_1 = arith.constant 0 : i32
    return %c0_i32, %c0_i32_0 : i32, i32
  }
  func.func @transform_2(%arg0: i32) -> (i32, i32) {
    %c0_i32 = arith.constant 0 : i32
    %c0_i32_0 = arith.constant 0 : i32
    %c0_i32_1 = arith.constant 0 : i32
    return %c0_i32, %c0_i32_0 : i32, i32
  }
  func.func @transform_3(%arg0: i32) -> (i32, i32) {
    %c0_i32 = arith.constant 0 : i32
    %c0_i32_0 = arith.constant 0 : i32
    %c0_i32_1 = arith.constant 0 : i32
    return %c0_i32, %c0_i32_0 : i32, i32
  }
  func.func @transform_4(%arg0: i32) -> (i32, i32) {
    %c0_i32 = arith.constant 0 : i32
    %c0_i32_0 = arith.constant 0 : i32
    %c0_i32_1 = arith.constant 0 : i32
    return %c0_i32, %c0_i32_0 : i32, i32
  }
  func.func @transform_5(%arg0: i32) -> (i32, i32, i32) {
    %c0_i32 = arith.constant 0 : i32
    %c0_i32_0 = arith.constant 0 : i32
    %c0_i32_1 = arith.constant 0 : i32
    return %arg0, %c0_i32, %c0_i32_0 : i32, i32, i32
  }
}

</mosaic_0001>

<bundles_post_ra>
// kernel: tpu_custom_call.1
= control target key start
LH: loop header
LB: loop body
LE: loop exit
PB: predicated region body
PF: predicated region fallthrough
CT: control target
= control target key end

     0   :  { %10 = vsyncpa [#allocation3], 0  ;;  %s692_s0 = inlined_call_operand.hbm [shape: f32[2,48,64], index: 0, kind: input, shape index: {}]   ;;  %s693_s1 = inlined_call_operand.vmem [shape: f32[8,48], index: 1, kind: input, shape index: {}]   ;;  %s694_s2 = inlined_call_operand.vmem [shape: f32[8,1], index: 2, kind: input, shape index: {}]   ;;  %s695_s3 = inlined_call_operand.vmem [shape: f32[8,1], index: 3, kind: input, shape index: {}]   ;;  %s696_s4 = inlined_call_operand.vmem [shape: f32[8,1], index: 4, kind: input, shape index: {}]   ;;  %s697_s5 = inlined_call_operand.hbm [shape: f32[2,8,64], index: 5, kind: output, shape index: {}]  }
   0x1   :  { %12 = vsyncpa [#allocation3 + $0x1], 0 }
   0x2   :  { %13 = vsyncpa [#allocation4], 0 }
   0x3   :  { %15 = vsyncpa [#allocation4 + $0x1], 0  ;;  %s568_s18 = smov 0   ;;  %s570_s19 = smov 0  }
   0x4   :  { %s572_s20 = smov 0   ;;  %s574_s21 = smov 0  }
   0x5 LB: > { %s589_s3 = sadd.s32 4294967295, %s533_s21   ;;  %s373_s4 = sadd.s32 4294967294, %s533_s21   ;;  %s533_s21 = sphi %s574_s21, %s705_s21   ;;  %s529_s20 = sphi %s572_s20, %s704_s20   ;;  %s525_s19 = sphi %s570_s19, %s703_s19   ;;  %s521_s18 = sphi %s568_s18, %s702_s18  }
   0x6   : > { %s593_s22 = sadd.s32 1, %s533_s21   ;;  %s28_s23 = sadd.s32 1, %s529_s20 }
   0x7   : > { %s25_s24 = ssub.s32 %s533_s21, %s593_s22  ;;  %p35_p0 = scmp.ne.s32.totalorder %s529_s20, %s525_s19 }
   0x8   : > { %p26_p1 = scmp.eq.s32.totalorder %s25_s24, 0  ;;  %p36_p2 = scmp.eq.s32.totalorder %s533_s21, 0 }
   0x9   : > { %p41_p3 = scmp.ne.s32.totalorder %s525_s19, %s521_s18  ;;  %p42_p4 = scmp.eq.s32.totalorder %s589_s3, 0 }
   0xa   : > { %s605_s25 = scalar_select %p26_p1, %s529_s20, %s28_s23  }
   0xb   : > { %p37_p5 = por %p36_p2, %p35_p0  ;;  %p607_p6 = por %p42_p4, %p41_p3 }
   0xc   : > { %p149_p7 = scmp.eq.s32.totalorder %s589_s3, 1  ;;  %p155_p8 = scmp.eq.s32.totalorder %s373_s4, 1 }
   0xd   : > { %p375_p9 = scmp.ge.s32.totalorder %s533_s21, 2  ;;  %p399_p10 = scmp.lt.s32.totalorder %s533_s21, 2 }
   0xe   : > { %p614_p11 = por %p149_p7, %p35_p0  ;;  %p618_p12 = por %p155_p8, %p41_p3 }
   0xf   : > { %s187_s29 = sand.u32 1, %s529_s20   ;;  %s385_s30 = smul.u32 48, %s533_s21 }
  0x10   : > { %s384_s6 = smul.u32 48, %s187_s29  ;;  %p627_p13 = pnand %p399_p10, %p37_p5 }
  0x11   : > { %s196_s9 = scalar_lea.hbm %s692_s0, %s385_s30  ;;  %s188_s14 = scalar_lea.sflag [#allocation3], %s187_s29 }
  0x12   : > { %s197_s11 = sshll.u32 %s196_s9, 4  ;;  %s191_s12 = scalar_lea.vmem [#allocation2], %s384_s6  ;;  %s198_s11 = int_to_ptr.hbm [resolvable:$true] %s197_s11 }
  0x13   : > { %s199_s13 = sshll.u32 %s191_s12, 4  ;;  %s437_s15 = sshra.s32 %s198_s11, 4  ;;  %s200_s13 = int_to_ptr.vmem [resolvable:$true] %s199_s13  ;;  %s438_s15 = int_to_ptr.hbm [resolvable:$true] %s437_s15 }
  0x14   : > { %s439_s16 = scalar_lea.hbm %s438_s15, 48  ;;  %p441_p1 = pneg %p627_p13 }
  0x15   : > { %p440_p0 = scmp.ne.s32.totalorder %s438_s15, %s439_s16  ;;  %s444_s23 = scalar_lea.hbm %s692_s0, 96 }
  0x16   : > { %p445_p4 = scmp.lt.s32.totalorder %s438_s15, %s692_s0  ;;  %p446_p5 = scmp.lt.s32.totalorder %s444_s23, %s439_s16 }
  0x17   : > { %p442_p2 = pnand %p441_p1, %p440_p0 }
  0x18   : > { %p447_p7 = por %p446_p5, %p445_p4 }
  0x19   : > { %p443_p3 = pneg %p442_p2 }
  0x1b   : > { %p448_p8 = pnand %p447_p7, %p443_p3 }
  0x1d   : > { %451 = shalt.err (!%p448_p8)
}
  0x1e   : > { %s535_s29 = smov 128   ;;  %s536_s6 = smov 8  }
  0x1f   : > { %394 = dma.hbm_to_vmem [thread:$0]  (!%p627_p13), %s198_s11, 768, %s200_s13, %s188_s14, %s535_s29, %s535_s29, %s536_s6  }
  0x20   : > { %p377_p10 = scmp.ge.s32.totalorder %s533_s21, 1  ;;  %p207_p0 = scmp.lt.s32.totalorder %s533_s21, 3 }
  0x22   : > { %p208_p1 = pnand %p377_p10, %p207_p0 }
  0x23   : > { %s644_s7 = sand.u32 (!%p208_p1), 1, %s525_s19  }
  0x24   : > { %211 = sbr.rel (%p208_p1) target bundleno = 188 (0xbc), region = 40  ;;  %s214_s9 = scalar_lea.sflag (!%p208_p1), [#allocation3], %s644_s7 }
  0x25   : > { %s386_s8 = smul.u32 (!%p208_p1), 48, %s644_s7 }
  0x27   : > { %s217_s12 = scalar_lea.vmem (!%p208_p1), [#allocation2], %s386_s8 }
  0x29   : > { %512 = dma.done.wait (%p607_p6), %s214_s9, 768  }
  0x2a   : > { %514 = vsyncadd (%p607_p6), %s214_s9, 4294966528  ;;  %v537_v0 = vmov 0   ;;  %v251_v1 = vld [vmem:[%s217_s12 + $0x28] sm:$0xff]  ;;  %v250_v2 = vld [vmem:[%s217_s12 + $0x20] sm:$0xff]  ;;  %vm258_vm0 = vcmask 392192   ;;  %s378_s14 = sshll.u32 %s644_s7, 3 }
  0x2b   : > { %436 = vset.pattern.permute.xlu0 %v537_v0  ;;  %272 = vmatpush.msra.mxu0 %v251_v1  ;;  %v249_v3 = vld [vmem:[%s217_s12 + $0x18] sm:$0xff]  ;;  %v252_v4 = vld [vmem:[%s694_s2] sm:$0xff]  ;;  %v247_v6 = vld [vmem:[%s217_s12 + $0x8] sm:$0xff]  ;;  %s381_s15 = sshll.u32 %s589_s3, 3  ;;  %s244_s23 = scalar_lea.vmem [#allocation5], %s378_s14  ;;  %vm285_vm2 = vcmask 523264  }
  0x2c   : > { %255 = vperm.xlu0 %436, %v252_v4   ;;  %v248_v5 = vld [vmem:[%s217_s12 + $0x10] sm:$0xff]  ;;  %v246_v7 = vld [vmem:[%s217_s12] sm:$0xff]  ;;  %s298_s4 = scalar_lea.hbm %s697_s5, %s381_s15  ;;  %s300_s24 = sshll.u32 %s244_s23, 4  ;;  %s301_s24 = int_to_ptr.vmem [resolvable:$true] %s300_s24 }
  0x2d   : > { %273 = vmatpush.msra.mxu0 %v250_v2  ;;  %v245_v8 = vld [vmem:[%s693_s1] sm:$0xff]  ;;  %s302_s30 = sshll.u32 %s298_s4, 4  ;;  %s288_s29 = scalar_lea.sflag [#allocation4], %s644_s7  ;;  %s303_s30 = int_to_ptr.hbm [resolvable:$true] %s302_s30 }
  0x2e   : > { %s481_s3 = sshra.s32 %s303_s30, 4  ;;  %s487_s12 = scalar_lea.hbm %s697_s5, 16  ;;  %s482_s3 = int_to_ptr.hbm [resolvable:$true] %s481_s3 }
  0x2f   : > { %274 = vmatpush.msra.mxu0 %v249_v3  ;;  %s483_s6 = scalar_lea.hbm %s482_s3, 8  ;;  %p488_p3 = scmp.lt.s32.totalorder %s482_s3, %s697_s5 }
  0x30   : > { %p484_p6 = scmp.ne.s32.totalorder %s482_s3, %s483_s6  ;;  %p489_p4 = scmp.lt.s32.totalorder %s487_s12, %s483_s6 }
  0x31   : > { %275 = vmatpush.msra.mxu0 %v248_v5 }
  0x32   : > { %p485_p13 = pnand %p484_p6, %p614_p11  ;;  %p490_p5 = por %p489_p4, %p488_p3 }
  0x33   : > { %276 = vmatpush.msra.mxu0 %v247_v6 }
  0x34   : > { %p486_p2 = pneg %p485_p13 }
  0x35   : > { %277 = vmatpush.msra.mxu0 %v246_v7 }
  0x36   : > { %379 = vmatmul.msk.f32.vlgmr.msra.gmra.mxu0 %vm258_vm0, %v245_v8  ;;  %p491_p7 = pnand %p490_p5, %p486_p2 }
  0x9e   : > { %v256_v9 = vpop.permute.xlu0 %255 }
  0xb3   : > { %v279_v10 = vpop.f32.mrf.mxu0 }
  0xb4   : > { %v280_v11 = vadd.f32 %v279_v10, %v256_v9 }
  0xb6   : > { %vm282_vm1 = vcmp.ge.f32.partialorder %v280_v11, 0.0  ;;  %v283_v12 = vmul.f32 0.2, %v280_v11 }
  0xb8   : > { %v284_v13 = vsel %vm282_vm1, %v280_v11, %v283_v12 }
  0xb9   : > { %286 = vst.msk [vmem:[%s244_s23] sm:$0xff] %vm285_vm2, %v284_v13 }
  0xba   : > { %494 = shalt.err (!%p491_p7)
}
  0xbb   : > { %389 = dma.vmem_to_hbm [thread:$0]  (%p614_p11), %s301_s24, 128, %s303_s30, %s288_s29  }
  0xbc PF: > { %s314_s7 = sand.u32 1, %s521_s18   ;;  %p396_p8 = pnand %p375_p9, %p618_p12 }
  0xbd   : > { %s315_s26 = scalar_lea.sflag [#allocation4], %s314_s7 }
  0xbe   : > { %p397_p10 = pneg %p396_p8 }
  0xc0   : > { %516 = dma.done.wait (%p397_p10), %s315_s26, 128  }
  0xc1   : > { %518 = vsyncadd (%p397_p10), %s315_s26, 4294967168  ;;  %p18_p0 = scmp.ge.s32.totalorder %s593_s22, 4   ;;  %s702_s18 = smov %s525_s19 }
  0xc2   : > { %s703_s19 = smov %s529_s20  ;;  %s704_s20 = smov %s605_s25 }
  0xc3   : > { %s705_s21 = smov %s593_s22  ;;  %20 = sbr.rel (!%p18_p0) target bundleno = 5 (0x5), region = 85 }
  0xc8   :  { %321 = vsyncpa [#allocation3], 1 }
  0xc9   :  { %323 = vsyncpa [#allocation3 + $0x1], 1 }
  0xca   :  { %324 = vsyncpa [#allocation4], 1 }
  0xcb   :  { %326 = vsyncpa [#allocation4 + $0x1], 1 }

</bundles_post_ra>
